<compile_context>
chip_gen: v7x
topology: tpu7x:2x2x1
jax: 0.10.0
libtpu: 0.0.40
codegen_flags: <defaults>
</compile_context>

<pallas_src>
import jax
import jax.numpy as jnp
import numpy as np
from jax.experimental import pallas as pl
from jax.experimental.pallas import tpu as pltpu

EMBEDDING_SIZE = 128
QUANTIZE_MIN_VAL = -2.0
QUANTIZE_MAX_VAL = 2.0
_QUANT_SCALE = 255.0 / (QUANTIZE_MAX_VAL - QUANTIZE_MIN_VAL)

# Row-tile selection constants.
_ROW_ALIGN = 32          # sublane-friendly for f32 (8,128) and uint8 (32,128)
_SINGLE_BLOCK_ROWS = 1024  # below this, one block: per-step overhead dominates
_MIN_GRID_STEPS = 8      # large batches: >= 8 steps so v7x gets >=4 per core


def _round_up(n, m):
    return ((n + m - 1) // m) * m


def _choose_block_rows(batch, tm):
    """Pick the per-grid-step row tile (never larger than needed)."""
    tm = max(_round_up(tm, _ROW_ALIGN), _ROW_ALIGN)
    single = max(_round_up(batch, _ROW_ALIGN), _ROW_ALIGN)
    if single <= min(tm, _SINGLE_BLOCK_ROWS):
        # Small batch: one (possibly ragged) block, no pipeline machinery.
        return single
    # Large batch: big tiles to amortize the ~0.35 us per-step overhead, but
    # keep at least _MIN_GRID_STEPS steps so dimension_semantics=("parallel",)
    # can shard the grid across both TensorCores on v7x.
    per_step = _round_up(pl.cdiv(batch, _MIN_GRID_STEPS), _ROW_ALIGN)
    return max(_ROW_ALIGN, min(tm, per_step))


def _postprocess_kernel(x_ref, evecs_t_ref, bias_ref, o_ref):
    # x_ref:       (tm, E)  VMEM tile of embeddings (f32 or bf16)
    # evecs_t_ref: (E, E)   PCA eigenvectors, pre-transposed (E^T), resident
    # bias_ref:    (1, E)   precomputed  -(means^T @ E^T)  row (f32), resident
    # o_ref:       (tm, E)  quantized output (float32 or uint8, values 0..255)
    pca = jnp.dot(x_ref[...], evecs_t_ref[...],
                  preferred_element_type=jnp.float32)        # MXU matmul
    pca = pca + bias_ref[...]                                 # fused mean term
    clipped = jnp.clip(pca, QUANTIZE_MIN_VAL, QUANTIZE_MAX_VAL)
    q = jnp.round((clipped - QUANTIZE_MIN_VAL) * _QUANT_SCALE)  # in [0, 255]
    o_ref[...] = q.astype(o_ref.dtype)


def _postprocess_call(x, evecs_t, bias, *, tm, out_dtype):
    """Launch the Pallas kernel. No padding / slicing: ragged blocks are masked."""
    B, E = x.shape
    assert E == EMBEDDING_SIZE, f"Bad embedding size {E}"
    block_rows = _choose_block_rows(B, tm)
    grid = (pl.cdiv(B, block_rows),)

    return pl.pallas_call(
        _postprocess_kernel,
        out_shape=jax.ShapeDtypeStruct((B, E), out_dtype),
        grid_spec=pltpu.PrefetchScalarGridSpec(
            num_scalar_prefetch=0,
            grid=grid,
            in_specs=[
                pl.BlockSpec((block_rows, E), lambda i: (i, 0)),
                pl.BlockSpec((E, E), lambda i: (0, 0)),   # resident weights
                pl.BlockSpec((1, E), lambda i: (0, 0)),   # resident bias row
            ],
            out_specs=pl.BlockSpec((block_rows, E), lambda i: (i, 0)),
        ),
        compiler_params=pltpu.CompilerParams(
            dimension_semantics=("parallel",)),
    )(x, evecs_t, bias)


def make_postprocessor(pca_eigen_vectors, pca_means, *,
                       tm=2048, out_dtype=jnp.float32):
    """Build a postprocessor with checkpoint constants precomputed ONCE.

    This is the hot-path entry point: the eigenvector transpose and the folded
    bias (-means^T @ E^T) are computed on the host here, not as per-call XLA
    ops.  The returned callable maps [B, 128] embeddings -> [B, 128] quantized
    embeddings (values 0..255).

    Pass out_dtype=jnp.uint8 if the result does not need to carry gradients:
    it halves total HBM traffic (the kernel is bandwidth bound) with identical
    values.  Note: folding the mean into the bias reassociates f32 math, so a
    value landing exactly on a quantization bin edge may round one level
    differently than the torch reference.
    """
    ev = np.asarray(pca_eigen_vectors, dtype=np.float32)
    mu = np.asarray(pca_means, dtype=np.float32).reshape(1, EMBEDDING_SIZE)
    assert ev.shape == (EMBEDDING_SIZE, EMBEDDING_SIZE)

    evecs_t_np = np.ascontiguousarray(ev.T)        # kernel computes x @ E^T
    bias_np = -(mu @ ev.T)                         # [1, E] folded mean term

    evecs_t_f32 = jnp.asarray(evecs_t_np, dtype=jnp.float32)
    bias_f32 = jnp.asarray(bias_np, dtype=jnp.float32)

    def apply(embeddings, *, tm=tm, out_dtype=out_dtype):
        # Do NOT cast embeddings here: a standalone wrapper cast would add a
        # full extra pass over HBM.  bf16 inputs go straight to the MXU; the
        # (tiny, 64 KiB) eigenvector constant is matched to the input dtype.
        x = embeddings
        evecs_t = (evecs_t_f32 if x.dtype == jnp.float32
                   else evecs_t_f32.astype(x.dtype))
        return _postprocess_call(x, evecs_t, bias_f32, tm=tm,
                                 out_dtype=out_dtype)

    return apply


def postprocess(embeddings, pca_eigen_vectors, pca_means, *,
                tm=2048, out_dtype=jnp.float32):
    """One-shot convenience wrapper (folds constants per call).

    Prefer make_postprocessor() on hot paths so the checkpoint constants are
    not recomputed every invocation.
    """
    return make_postprocessor(pca_eigen_vectors, pca_means,
                              tm=tm, out_dtype=out_dtype)(embeddings)


def postprocess_ref(embeddings, pca_eigen_vectors, pca_means):
    """Pure-JAX reference mirroring the torch code exactly."""
    pca_applied = jnp.matmul(pca_eigen_vectors, embeddings.T - pca_means).T
    clipped = jnp.clip(pca_applied, QUANTIZE_MIN_VAL, QUANTIZE_MAX_VAL)
    return jnp.round((clipped - QUANTIZE_MIN_VAL) * _QUANT_SCALE)


if __name__ == "__main__":
    key = jax.random.PRNGKey(0)
    k_x, k_e, k_m, k_x2 = jax.random.split(key, 4)

    B = 8  # small batch of VGGish embeddings
    # Deterministic synthetic "PCA params" (no checkpoint loading).
    # TODO(synk): real weights come from vggish_pca_params-970ea276.pth; synthesized here.
    embeddings = jax.random.normal(k_x, (B, EMBEDDING_SIZE), dtype=jnp.float32)
    pca_eigen_vectors = jax.random.normal(
        k_e, (EMBEDDING_SIZE, EMBEDDING_SIZE), dtype=jnp.float32) * 0.1
    pca_means = jax.random.normal(
        k_m, (EMBEDDING_SIZE, 1), dtype=jnp.float32) * 0.05

    post = make_postprocessor(pca_eigen_vectors, pca_means)

    # Primary (torch-matching) float32 path.
    out = jax.block_until_ready(post(embeddings))
    ref = postprocess_ref(embeddings, pca_eigen_vectors, pca_means)
    assert out.shape == (B, EMBEDDING_SIZE) and out.dtype == jnp.float32
    # Folding the mean into a bias reassociates the f32 math, so a value that
    # lands exactly on a quantization bin edge may round one step differently;
    # allow at most one quantization level of difference.
    diff = np.abs(np.asarray(out) - np.asarray(ref))
    assert diff.max() <= 1.0, f"mismatch vs reference (max diff {diff.max()})"

    # uint8 output path (4x smaller HBM writeback), same values.
    out_u8 = jax.block_until_ready(post(embeddings, out_dtype=jnp.uint8))
    assert out_u8.dtype == jnp.uint8 and out_u8.shape == (B, EMBEDDING_SIZE)
    diff_u8 = np.abs(np.asarray(out_u8, dtype=np.float32) - np.asarray(ref))
    assert diff_u8.max() <= 1.0, "uint8 path mismatch vs reference"

    # Ragged / multi-step tiled path: batch not a multiple of the tile, no
    # wrapper pad or slice — Pallas masks the ragged last block's writes.
    B2 = 200
    emb2 = jax.random.normal(k_x2, (B2, EMBEDDING_SIZE), dtype=jnp.float32)
    out2 = jax.block_until_ready(post(emb2, tm=64))  # forces grid > 1
    ref2 = postprocess_ref(emb2, pca_eigen_vectors, pca_means)
    assert out2.shape == (B2, EMBEDDING_SIZE)
    diff2 = np.abs(np.asarray(out2) - np.asarray(ref2))
    assert diff2.max() <= 1.0, f"tiled path mismatch (max diff {diff2.max()})"

    print("KERNEL_OK")
</pallas_src>

<mosaic_0001>
module attributes {stable_mosaic.version = 11 : i64} {
  func.func @_postprocess_kernel(%arg0: i32, %arg1: memref<32x128xf32, #tpu.memory_space<vmem>>, %arg2: memref<128x128xf32, #tpu.memory_space<vmem>>, %arg3: memref<1x128xf32, #tpu.memory_space<vmem>>, %arg4: memref<32x128xf32, #tpu.memory_space<vmem>>) attributes {dimension_semantics = [#tpu.dimension_semantics<parallel>], iteration_bounds = array<i64: 1>, scalar_prefetch = 0 : i64, scratch_operands = 0 : i64, tpu.core_type = #tpu.core_type<tc>, window_params = [{transform_indices = @transform_0, window_bounds = array<i64: 32, 128>}, {pipeline_mode = #tpu.pipeline_mode<synchronous>, transform_indices = @transform_1, window_bounds = array<i64: 128, 128>}, {pipeline_mode = #tpu.pipeline_mode<synchronous>, transform_indices = @transform_2, window_bounds = array<i64: 1, 128>}, {transform_indices = @transform_3, window_bounds = array<i64: 32, 128>}]} {
    %c0 = arith.constant 0 : index
    %c0_0 = arith.constant 0 : index
    %0 = vector.load %arg1[%c0, %c0_0] : memref<32x128xf32, #tpu.memory_space<vmem>>, vector<32x128xf32>
    %c0_1 = arith.constant 0 : index
    %c0_2 = arith.constant 0 : index
    %1 = vector.load %arg2[%c0_1, %c0_2] : memref<128x128xf32, #tpu.memory_space<vmem>>, vector<128x128xf32>
    %cst = arith.constant dense<0.000000e+00> : vector<32x128xf32>
    %2 = tpu.matmul %0, %1, %cst {dimension_numbers = #tpu.dot_dimension_numbers<[1], [0], [0], [1], [0, 0, 1, 1], [], []>} : vector<32x128xf32>, vector<128x128xf32>, vector<32x128xf32> -> vector<32x128xf32>
    %c0_3 = arith.constant 0 : index
    %c0_4 = arith.constant 0 : index
    %3 = vector.load %arg3[%c0_3, %c0_4] : memref<1x128xf32, #tpu.memory_space<vmem>>, vector<1x128xf32>
    %4 = vector.broadcast %3 : vector<1x128xf32> to vector<32x128xf32>
    %5 = arith.addf %2, %4 : vector<32x128xf32>
    %cst_5 = arith.constant -2.000000e+00 : f32
    %cst_6 = arith.constant 2.000000e+00 : f32
    %6 = vector.broadcast %cst_5 : f32 to vector<32x128xf32>
    %7 = arith.maximumf %6, %5 : vector<32x128xf32>
    %8 = vector.broadcast %cst_6 : f32 to vector<32x128xf32>
    %9 = arith.minimumf %8, %7 : vector<32x128xf32>
    %cst_7 = arith.constant -2.000000e+00 : f32
    %10 = vector.broadcast %cst_7 : f32 to vector<32x128xf32>
    %11 = arith.subf %9, %10 : vector<32x128xf32>
    %cst_8 = arith.constant 6.375000e+01 : f32
    %12 = vector.broadcast %cst_8 : f32 to vector<32x128xf32>
    %13 = arith.mulf %11, %12 : vector<32x128xf32>
    %14 = math.roundeven %13 : vector<32x128xf32>
    %c0_9 = arith.constant 0 : index
    %c0_10 = arith.constant 0 : index
    %15 = vector.load %arg4[%c0_9, %c0_10] : memref<32x128xf32, #tpu.memory_space<vmem>>, vector<32x128xf32>
    tpu.vector_store %arg4[%c0_9, %c0_10], %14 {strides = array<i32>} : memref<32x128xf32, #tpu.memory_space<vmem>>, vector<32x128xf32>,
    return
  }
  func.func @transform_0(%arg0: i32) -> (i32, i32) {
    %c0_i32 = arith.constant 0 : i32
    %c0_i32_0 = arith.constant 0 : i32
    return %arg0, %c0_i32 : i32, i32
  }
  func.func @transform_1(%arg0: i32) -> (i32, i32) {
    %c0_i32 = arith.constant 0 : i32
    %c0_i32_0 = arith.constant 0 : i32
    %c0_i32_1 = arith.constant 0 : i32
    return %c0_i32, %c0_i32_0 : i32, i32
  }
  func.func @transform_2(%arg0: i32) -> (i32, i32) {
    %c0_i32 = arith.constant 0 : i32
    %c0_i32_0 = arith.constant 0 : i32
    %c0_i32_1 = arith.constant 0 : i32
    return %c0_i32, %c0_i32_0 : i32, i32
  }
  func.func @transform_3(%arg0: i32) -> (i32, i32) {
    %c0_i32 = arith.constant 0 : i32
    %c0_i32_0 = arith.constant 0 : i32
    return %arg0, %c0_i32 : i32, i32
  }
}

</mosaic_0001>

<bundles_post_ra>
// kernel: tpu_custom_call.1
= control target key start
LH: loop header
LB: loop body
LE: loop exit
PB: predicated region body
PF: predicated region fallthrough
CT: control target
= control target key end

     0   :  { %8 = vsyncpa [#allocation3], 0  ;;  %s466_s0 = inlined_call_operand.hbm [shape: f32[8,128], index: 0, kind: input, shape index: {}]   ;;  %s467_s1 = inlined_call_operand.hbm [shape: f32[128,128], index: 1, kind: input, shape index: {}]   ;;  %s468_s2 = inlined_call_operand.vmem [shape: f32[1,128], index: 2, kind: input, shape index: {}]   ;;  %s469_s3 = inlined_call_operand.hbm [shape: f32[8,128], index: 3, kind: output, shape index: {}]  }
   0x1   :  { %9 = vsyncpa [#allocation6], 0 }
   0x2   :  { %10 = vsyncpa [#allocation4], 0 }
   0x3   :  { %15 = vsyncadd [#allocation3], 384  ;;  %s393_s12 = smov [#allocation2]   ;;  %s321_s16 = scalar_lea.hbm %s466_s0, 128 }
   0x4   :  { %s16_s13 = sshll.u32 %s393_s12, 4  ;;  %p322_p0 = scmp.ne.s32.totalorder %s466_s0, %s321_s16  ;;  %s17_s13 = int_to_ptr.vmem [resolvable:$true] %s16_s13 }
   0x5   :  { %p325_p1 = scmp.lt.u32.totalorder %s321_s16, %s466_s0 }
   0x7   :  { %p327_p2 = pnand %p325_p1, %p322_p0 }
   0x9   :  { %330 = shalt.err (!%p327_p2)
}
   0xa   :  { %s331_s21 = scalar_lea.vmem %s17_s13, 128  ;;  %s335_s22 = scalar_lea.vmem %s17_s13, 512 }
   0xb   :  { %p332_p3 = scmp.ne.s32.totalorder %s17_s13, %s331_s21  ;;  %p336_p4 = scmp.lt.s32.totalorder %s17_s13, %s17_s13 }
   0xc   :  { %p337_p5 = scmp.lt.s32.totalorder %s335_s22, %s331_s21 }
   0xe   :  { %p338_p6 = por %p337_p5, %p336_p4 }
  0x10   :  { %p339_p7 = pnand %p338_p6, %p332_p3 }
  0x12   :  { %342 = shalt.err (!%p339_p7)
}
  0x13   :  { %s394_s23 = smov 128   ;;  %s395_s24 = smov 8  }
  0x14   :  { %22 = dma.hbm_to_vmem [thread:$0]  %s466_s0, 128, %s17_s13, [#allocation3], %s394_s23, %s394_s23, %s395_s24  }
  0x15   :  { %s396_s27 = smov [#allocation5]   ;;  %s343_s4 = scalar_lea.hbm %s467_s1, 2048 }
  0x16   :  { %s28_s28 = sshll.u32 %s396_s27, 4  ;;  %p344_p8 = scmp.ne.s32.totalorder %s467_s1, %s343_s4  ;;  %s29_s28 = int_to_ptr.vmem [resolvable:$true] %s28_s28 }
  0x17   :  { %p347_p9 = scmp.lt.u32.totalorder %s343_s4, %s467_s1 }
  0x19   :  { %p349_p10 = pnand %p347_p9, %p344_p8 }
  0x1b   :  { %352 = shalt.err (!%p349_p10)
}
  0x1c   :  { %s353_s9 = scalar_lea.vmem %s29_s28, 2048  ;;  %p358_p12 = scmp.lt.s32.totalorder %s29_s28, %s29_s28 }
  0x1d   :  { %p354_p11 = scmp.ne.s32.totalorder %s29_s28, %s353_s9  ;;  %p359_p13 = scmp.lt.s32.totalorder %s353_s9, %s353_s9 }
  0x1f   :  { %p360_p0 = por %p359_p13, %p358_p12 }
  0x21   :  { %p361_p1 = pnand %p360_p0, %p354_p11 }
  0x23   :  { %364 = shalt.err (!%p361_p1)
}
  0x24   :  { %34 = dma.hbm_to_vmem [thread:$0]  %s467_s1, 2048, %s29_s28, [#allocation6], %s394_s23, %s394_s23, %s395_s24  }
  0x25   :  { %387 = dma.done.wait [#allocation3], 512  }
  0x26   :  { %388 = vsyncadd [#allocation3], 4294966784 }
  0x27   :  { %389 = dma.done.wait [#allocation6], 2048  }
  0x28   :  { %390 = vsyncadd [#allocation6], 4294965248  ;;  %v47_v0 = vld [vmem:[#allocation5] sm:$0xff]  ;;  %v48_v1 = vld [vmem:[#allocation5 + $0x8] sm:$0xff] }
  0x29   :  { %v49_v2 = vld [vmem:[#allocation5 + $0x10] sm:$0xff]  ;;  %v264_v3 = vpack.c.bf16 %v48_v1, %v47_v0  ;;  %v50_v4 = vld [vmem:[#allocation5 + $0x18] sm:$0xff]  ;;  %v51_v6 = vld [vmem:[#allocation5 + $0x20] sm:$0xff] }
  0x2a   :  { %v268_v5 = vpack.c.bf16 %v50_v4, %v49_v2  ;;  %v52_v7 = vld [vmem:[#allocation5 + $0x28] sm:$0xff]  ;;  %v43_v9 = vld [vmem:[#allocation2] sm:$0xff]  ;;  %v45_v10 = vld [vmem:[#allocation2 + $0x10] sm:$0xff] }
  0x2b   :  { %265 = vmatprep.subr.bf16.mxu0 %v264_v3  ;;  %296 = vmatprep.subr.bf16.mxu1 %v264_v3  ;;  %v272_v8 = vpack.c.bf16 %v52_v7, %v51_v6  ;;  %v53_v11 = vld [vmem:[#allocation5 + $0x30] sm:$0xff]  ;;  %v54_v12 = vld [vmem:[#allocation5 + $0x38] sm:$0xff]  ;;  %v55_v14 = vld [vmem:[#allocation5 + $0x40] sm:$0xff] }
  0x2c   :  { %267 = vmatpush3.bf16.msra.mxu0 %v264_v3  ;;  %304 = vmatpush3.bf16.msra.mxu1 %v264_v3  ;;  %v276_v13 = vpack.c.bf16 %v54_v12, %v53_v11  ;;  %v56_v15 = vld [vmem:[#allocation5 + $0x48] sm:$0xff]  ;;  %v57_v17 = vld [vmem:[#allocation5 + $0x50] sm:$0xff]  ;;  %v58_v18 = vld [vmem:[#allocation5 + $0x58] sm:$0xff] }
  0x2d   :  { %269 = vmatprep.subr.bf16.mxu0 %v268_v5  ;;  %297 = vmatprep.subr.bf16.mxu1 %v268_v5  ;;  %v280_v16 = vpack.c.bf16 %v56_v15, %v55_v14  ;;  %v284_v19 = vpack.c.bf16 %v58_v18, %v57_v17  ;;  %v59_v20 = vld [vmem:[#allocation5 + $0x60] sm:$0xff]  ;;  %v60_v21 = vld [vmem:[#allocation5 + $0x68] sm:$0xff]  ;;  %v61_v23 = vld [vmem:[#allocation5 + $0x70] sm:$0xff] }
  0x2e   :  { %258 = vmatprep.mubr.f32.mxu0 %v43_v9  ;;  %261 = vmatprep.mubr.f32.mxu1 %v45_v10  ;;  %v288_v22 = vpack.c.bf16 %v60_v21, %v59_v20  ;;  %v62_v24 = vld [vmem:[#allocation5 + $0x78] sm:$0xff]  ;;  %v44_v26 = vld [vmem:[#allocation2 + $0x8] sm:$0xff]  ;;  %v197_v28 = vld [vmem:[%s468_s2] ss:$0 sm:$0xff] }
  0x2f   :  { %v292_v25 = vpack.c.bf16 %v62_v24, %v61_v23  ;;  %v46_v27 = vld [vmem:[#allocation2 + $0x18] sm:$0xff] }
  0x30   :  { %271 = vmatpush3.bf16.msra.mxu0 %v268_v5  ;;  %305 = vmatpush3.bf16.msra.mxu1 %v268_v5 }
  0x31   :  { %273 = vmatprep.subr.bf16.mxu0 %v272_v8  ;;  %298 = vmatprep.subr.bf16.mxu1 %v272_v8 }
  0x34   :  { %275 = vmatpush3.bf16.msra.mxu0 %v272_v8  ;;  %306 = vmatpush3.bf16.msra.mxu1 %v272_v8 }
  0x35   :  { %277 = vmatprep.subr.bf16.mxu0 %v276_v13  ;;  %299 = vmatprep.subr.bf16.mxu1 %v276_v13 }
  0x38   :  { %279 = vmatpush3.bf16.msra.mxu0 %v276_v13  ;;  %307 = vmatpush3.bf16.msra.mxu1 %v276_v13 }
  0x39   :  { %281 = vmatprep.subr.bf16.mxu0 %v280_v16  ;;  %300 = vmatprep.subr.bf16.mxu1 %v280_v16 }
  0x3c   :  { %283 = vmatpush3.bf16.msra.mxu0 %v280_v16  ;;  %308 = vmatpush3.bf16.msra.mxu1 %v280_v16 }
  0x3d   :  { %285 = vmatprep.subr.bf16.mxu0 %v284_v19  ;;  %301 = vmatprep.subr.bf16.mxu1 %v284_v19 }
  0x40   :  { %287 = vmatpush3.bf16.msra.mxu0 %v284_v19  ;;  %309 = vmatpush3.bf16.msra.mxu1 %v284_v19 }
  0x41   :  { %289 = vmatprep.subr.bf16.mxu0 %v288_v22  ;;  %302 = vmatprep.subr.bf16.mxu1 %v288_v22 }
  0x44   :  { %291 = vmatpush3.bf16.msra.mxu0 %v288_v22  ;;  %310 = vmatpush3.bf16.msra.mxu1 %v288_v22 }
  0x45   :  { %293 = vmatprep.subr.bf16.mxu0 %v292_v25  ;;  %303 = vmatprep.subr.bf16.mxu1 %v292_v25 }
  0x48   :  { %295 = vmatpush3.bf16.msra.mxu0 %v292_v25  ;;  %311 = vmatpush3.bf16.msra.mxu1 %v292_v25 }
  0x4b   :  { %259 = vmatmul.mubr.f32.vlgmr.msra.gmra.mrb[0].mxu0 %v44_v26  ;;  %262 = vmatmul.mubr.f32.vlgmr.msra.gmra.mrb[0].mxu1 %v46_v27 }
 0x11e   :  { %v260_v29 = vpop.f32.mrb[0].mxu0  ;;  %v263_v30 = vpop.f32.mrb[0].mxu1 }
 0x11f   :  { %v142_v31 = vadd.f32 %v260_v29, %v197_v28  ;;  %v152_v32 = vadd.f32 %v263_v30, %v197_v28  ;;  %v136_v33 = vpop.f32.mrb[1].mxu0  ;;  %v146_v34 = vpop.f32.mrb[1].mxu1 }
 0x120   :  { %v137_v35 = vadd.f32 %v197_v28, %v136_v33  ;;  %v147_v36 = vadd.f32 %v197_v28, %v146_v34 }
 0x121   :  { %v199_v37 = vclamps-f32 %v142_v31, 2.0  ;;  %v201_v38 = vclamps-f32 %v152_v32, 2.0 }
 0x122   :  { %v198_v39 = vclamps-f32 %v137_v35, 2.0  ;;  %v200_v40 = vclamps-f32 %v147_v36, 2.0 }
 0x123   :  { %v203_v41 = vadd.f32 2.0, %v199_v37  ;;  %v205_v42 = vadd.f32 2.0, %v201_v38 }
 0x124   :  { %v202_v43 = vadd.f32 2.0, %v198_v39  ;;  %v204_v44 = vadd.f32 2.0, %v200_v40 }
 0x125   :  { %v168_v45 = vmul.f32 63.75, %v203_v41  ;;  %v170_v46 = vmul.f32 63.75, %v205_v42 }
 0x126   :  { %v167_v47 = vmul.f32 63.75, %v202_v43  ;;  %v169_v48 = vmul.f32 63.75, %v204_v44 }
 0x127   :  { %v313_v49 = vround.rtne.f32 %v168_v45  ;;  %v315_v50 = vround.rtne.f32 %v170_v46 }
 0x128   :  { %v312_v51 = vround.rtne.f32 %v167_v47  ;;  %v314_v52 = vround.rtne.f32 %v169_v48 }
 0x129   :  { %176 = vst [vmem:[#allocation7 + $0x8] sm:$0xff] %v313_v49  ;;  %178 = vst [vmem:[#allocation7 + $0x18] sm:$0xff] %v315_v50 }
 0x12a   :  { %175 = vst [vmem:[#allocation7] sm:$0xff] %v312_v51  ;;  %177 = vst [vmem:[#allocation7 + $0x10] sm:$0xff] %v314_v52 }
 0x12b   :  { %183 = vsyncadd [#allocation4], 384  ;;  %s397_s2 = smov [#allocation7]  }
 0x12c   :  { %s184_s12 = sshll.u32 %s397_s2, 4  ;;  %s185_s12 = int_to_ptr.vmem [resolvable:$true] %s184_s12 }
 0x12d   :  { %s365_s13 = scalar_lea.vmem %s185_s12, 128  ;;  %s369_s14 = scalar_lea.vmem %s185_s12, 512 }
 0x12e   :  { %p366_p2 = scmp.ne.s32.totalorder %s185_s12, %s365_s13  ;;  %p370_p3 = scmp.lt.s32.totalorder %s185_s12, %s185_s12 }
 0x12f   :  { %p371_p4 = scmp.lt.s32.totalorder %s369_s14, %s365_s13 }
 0x131   :  { %p372_p5 = por %p371_p4, %p370_p3 }
 0x133   :  { %p373_p6 = pnand %p372_p5, %p366_p2 }
 0x135   :  { %376 = shalt.err (!%p373_p6)
}
 0x136   :  { %s377_s17 = scalar_lea.hbm %s469_s3, 128 }
 0x137   :  { %p378_p7 = scmp.ne.s32.totalorder %s469_s3, %s377_s17  ;;  %p381_p8 = scmp.lt.u32.totalorder %s377_s17, %s469_s3 }
 0x139   :  { %p383_p9 = pnand %p381_p8, %p378_p7 }
 0x13b   :  { %386 = shalt.err (!%p383_p9)
}
 0x13c   :  { %190 = dma.vmem_to_hbm [thread:$0]  %s185_s12, 128, %s469_s3, [#allocation4], %s394_s23, %s394_s23, %s395_s24  }
 0x13d   :  { %391 = dma.done.wait [#allocation4], 512  }
 0x13e   :  { %392 = vsyncadd [#allocation4], 4294966784 }
 0x13f   :  { %194 = vsyncpa [#allocation3], 1 }
 0x140   :  { %195 = vsyncpa [#allocation6], 1 }
 0x141   :  { %196 = vsyncpa [#allocation4], 1 }

</bundles_post_ra>
